<compile_context>
chip_gen: v7x
topology: tpu7x:2x2x1
jax: 0.10.0
libtpu: 0.0.40
codegen_flags: <defaults>
</compile_context>

<pallas_src>
import jax
import jax.numpy as jnp
from jax import lax
from jax.experimental import pallas as pl
from jax.experimental.pallas import tpu as pltpu


def _decoder_seq_kernel(ids_ref,                        # [T, B] int32, SMEM (scalar prefetch)
                        emb_ref, h0_ref, ctx_ref,       # VMEM-resident inputs
                        wbig_ref, wfch_ref,
                        pred_ref, hout_ref,             # outputs
                        ebuf_ref, slab_ref, hstate_ref  # scratch
                        ):
    t = pl.program_id(0)
    B, H = hstate_ref.shape
    E = emb_ref.shape[-1]
    bf = jnp.bfloat16

    @pl.when(t == 0)
    def _():
        # One-time init: zero the slab, set the "bias lane" (column E+2H) to 1.0
        # (row E+2H of w_big holds all pre-packed biases), write bf16 context
        # once, load the initial hidden into the state scratch.
        lane = lax.broadcasted_iota(jnp.int32, slab_ref.shape, 1)
        slab_ref[...] = jnp.where(lane == E + 2 * H, 1.0, 0.0).astype(bf)
        slab_ref[:, E:E + H] = ctx_ref[...].astype(bf)
        hstate_ref[...] = h0_ref[...]

    # Embedding gather for this step's tokens (ids from SMEM), staged through a
    # tiny f32 buffer, then cast to bf16 into the slab's emb lanes.
    for b in range(B):
        tok = ids_ref[t, b]
        ebuf_ref[b:b + 1, :] = emb_ref[pl.ds(tok, 1), :]
    slab_ref[:, 0:E] = ebuf_ref[...].astype(bf)
    # TODO(synk): nn.Dropout is identity at inference; training-time mask not applied.

    # Current hidden (f32) carried across grid steps in scratch.
    h = hstate_ref[...]
    slab_ref[:, E + H:E + 2 * H] = h.astype(bf)

    # One MXU pass: [B, Kp] @ [Kp, 4H+O] -> [ r | z | n_i | n_h | fc_ec ],
    # all biases folded in via the bias lane.
    g = jnp.dot(slab_ref[...], wbig_ref[...], preferred_element_type=jnp.float32)

    r = jax.nn.sigmoid(g[:, 0:H])
    z = jax.nn.sigmoid(g[:, H:2 * H])
    n = jnp.tanh(g[:, 2 * H:3 * H] + r * g[:, 3 * H:4 * H])   # b_hn stays inside r*(.)
    h_new = (1.0 - z) * n + z * h                              # f32 convex combine

    # pred = [emb|ctx] @ W_fc_ec (+ b_fc), already in g, plus h_new @ W_fc_h.
    pred = g[:, 4 * H:] + jnp.dot(h_new.astype(bf), wfch_ref[...],
                                  preferred_element_type=jnp.float32)

    pred_ref[...] = pred            # [B, O] lane-dense store (step dim squeezed)
    hstate_ref[...] = h_new         # carries the recurrence
    hout_ref[...] = h_new           # final value is the hidden output


def decoder_decode(input_seq, hidden, context, kparams):
    """Run T decoder steps in ONE fused pallas_call.
    input_seq: [T, B] int32; hidden, context: [1, B, H] f32.
    Returns (predictions [T, B, O] f32, final hidden [1, B, H] f32)."""
    T, B = input_seq.shape
    H = hidden.shape[-1]
    emb_table = kparams["embedding"]
    V, E = emb_table.shape
    Kp, N = kparams["w_big"].shape
    O = kparams["w_fc_h"].shape[-1]
    assert E + 2 * H + 1 <= Kp

    h0 = hidden[0]                          # [B, H] f32
    ctx = context[0]                        # [B, H] f32

    def const(shape):                       # VMEM-resident input: DMA'd once
        return pl.BlockSpec(shape, lambda t, ids: (0,) * len(shape))

    grid_spec = pltpu.PrefetchScalarGridSpec(
        num_scalar_prefetch=1,
        grid=(T,),
        in_specs=[
            const((V, E)),                  # embedding table (16 KiB, resident)
            const((B, H)),                  # h0
            const((B, H)),                  # ctx
            const((Kp, N)),                 # fused gate + fc weights (+ bias row)
            const((H, O)),                  # fc weight for h_new
        ],
        out_specs=(
            pl.BlockSpec((None, B, O), lambda t, ids: (t, 0, 0)),   # per-step preds
            pl.BlockSpec((B, H), lambda t, ids: (0, 0)),            # final hidden
        ),
        scratch_shapes=[
            pltpu.VMEM((B, E), jnp.float32),        # embedding staging
            pltpu.VMEM((B, Kp), jnp.bfloat16),      # matmul LHS slab [emb|ctx|h|1]
            pltpu.VMEM((B, H), jnp.float32),        # recurrent hidden state
        ],
    )

    pred_seq, h_final = pl.pallas_call(
        _decoder_seq_kernel,
        grid_spec=grid_spec,
        out_shape=(jax.ShapeDtypeStruct((T, B, O), jnp.float32),
                   jax.ShapeDtypeStruct((B, H), jnp.float32)),
        compiler_params=pltpu.CompilerParams(
            dimension_semantics=("arbitrary",)),    # serial recurrence
    )(input_seq, emb_table, h0, ctx, kparams["w_big"], kparams["w_fc_h"])

    return pred_seq, h_final[None]


def decoder_forward(input_ids, hidden, context, kparams):
    """One decode step, matching Decoder.forward(input, hidden, context)."""
    pred_seq, h_new = decoder_decode(input_ids[None, :], hidden, context, kparams)
    return pred_seq[0], h_new


def init_torch_params(key, output_dim, emb_dim, hid_dim):
    """PyTorch-layout f32 parameters (fused GRU weights, fc [out, in])."""
    ks = jax.random.split(key, 7)

    def uni(k, shape, fan_in):
        bound = 1.0 / (fan_in ** 0.5)
        return jax.random.uniform(k, shape, jnp.float32, -bound, bound)

    in_rnn = emb_dim + hid_dim
    in_fc = emb_dim + 2 * hid_dim
    return dict(
        embedding=jax.random.normal(ks[0], (output_dim, emb_dim), jnp.float32),
        w_ih=uni(ks[1], (3 * hid_dim, in_rnn), hid_dim),    # gate order (r, z, n)
        w_hh=uni(ks[2], (3 * hid_dim, hid_dim), hid_dim),
        b_ih=uni(ks[3], (3 * hid_dim,), hid_dim),
        b_hh=uni(ks[4], (3 * hid_dim,), hid_dim),
        w_fc=uni(ks[5], (output_dim, in_fc), in_fc),        # fc input order [emb | h | ctx]
        b_fc=uni(ks[6], (output_dim,), in_fc),
    )


def pack_params(tp, emb_dim, hid_dim):
    """Pack PyTorch-layout params into the kernel's fused bf16 weight slab.
    Slab rows are [emb | ctx | h | bias-one | zero-pad]; w_big columns are
    [ r | z | n_i | n_h | fc_ec ]."""
    E, H = emb_dim, hid_dim
    O = tp["w_fc"].shape[0]
    K = E + 2 * H + 1
    K_pad = ((K + 127) // 128) * 128

    w_ih, w_hh = tp["w_ih"], tp["w_hh"]
    w_ir, w_iz, w_in = w_ih[:H], w_ih[H:2 * H], w_ih[2 * H:]       # [H, E+H]
    w_hr, w_hz, w_hn = w_hh[:H], w_hh[H:2 * H], w_hh[2 * H:]       # [H, H]
    b_ih, b_hh, b_fc = tp["b_ih"], tp["b_hh"], tp["b_fc"]

    wfcT = tp["w_fc"].T                          # [E+2H, O], row order [emb | h | ctx]
    fc_emb, fc_h, fc_ctx = wfcT[:E], wfcT[E:E + H], wfcT[E + H:]

    z_eh = jnp.zeros((E + H, H), jnp.float32)
    z_hh = jnp.zeros((H, H), jnp.float32)
    z_ho = jnp.zeros((H, O), jnp.float32)

    col_r = jnp.concatenate([w_ir.T, w_hr.T, (b_ih[:H] + b_hh[:H])[None]], axis=0)
    col_z = jnp.concatenate([w_iz.T, w_hz.T, (b_ih[H:2 * H] + b_hh[H:2 * H])[None]], axis=0)
    col_ni = jnp.concatenate([w_in.T, z_hh, b_ih[2 * H:][None]], axis=0)   # h rows zeroed
    col_nh = jnp.concatenate([z_eh, w_hn.T, b_hh[2 * H:][None]], axis=0)   # emb|ctx rows zeroed
    col_fc = jnp.concatenate([fc_emb, fc_ctx, z_ho, b_fc[None]], axis=0)   # [emb|ctx] half of fc

    w_big = jnp.concatenate([col_r, col_z, col_ni, col_nh, col_fc], axis=1)   # [K, 4H+O]
    if K_pad > K:
        w_big = jnp.concatenate(
            [w_big, jnp.zeros((K_pad - K, 4 * H + O), jnp.float32)], axis=0)

    return dict(
        embedding=tp["embedding"],
        w_big=w_big.astype(jnp.bfloat16),
        w_fc_h=fc_h.astype(jnp.bfloat16),
    )


def reference_forward(input_ids, hidden, context, tp):
    """Pure-JAX single-step reference mirroring the PyTorch forward (dropout =
    identity), with bf16 matmul operands / f32 accumulation like the kernel."""
    H = hidden.shape[-1]
    bf = jnp.bfloat16
    emb = jnp.take(tp["embedding"], input_ids, axis=0)
    ctx, h = context[0], hidden[0]

    x = jnp.concatenate([emb, ctx], axis=1).astype(bf)
    gi = jnp.dot(x, tp["w_ih"].T.astype(bf), preferred_element_type=jnp.float32) + tp["b_ih"]
    gh = jnp.dot(h.astype(bf), tp["w_hh"].T.astype(bf),
                 preferred_element_type=jnp.float32) + tp["b_hh"]
    r = jax.nn.sigmoid(gi[:, :H] + gh[:, :H])
    z = jax.nn.sigmoid(gi[:, H:2 * H] + gh[:, H:2 * H])
    n = jnp.tanh(gi[:, 2 * H:] + r * gh[:, 2 * H:])
    h_new = (1.0 - z) * n + z * h
    out = jnp.concatenate([emb, h_new, ctx], axis=1).astype(bf)
    pred = jnp.dot(out, tp["w_fc"].T.astype(bf),
                   preferred_element_type=jnp.float32) + tp["b_fc"]
    return pred, h_new[None]


if __name__ == "__main__":
    OUTPUT_DIM = 128   # vocab size
    EMB_DIM = 32
    HID_DIM = 32
    BATCH = 8
    SEQ = 8            # decode steps fused into one kernel call

    key = jax.random.PRNGKey(0)
    k_par, k_in, k_h, k_c = jax.random.split(key, 4)

    torch_params = init_torch_params(k_par, OUTPUT_DIM, EMB_DIM, HID_DIM)
    kparams = pack_params(torch_params, EMB_DIM, HID_DIM)

    input_seq = jax.random.randint(k_in, (SEQ, BATCH), 0, OUTPUT_DIM, dtype=jnp.int32)
    hidden = jax.random.normal(k_h, (1, BATCH, HID_DIM), jnp.float32)
    context = jax.random.normal(k_c, (1, BATCH, HID_DIM), jnp.float32)

    # Fused multi-step decode: one pallas_call for the whole sequence.
    pred_seq, h_final = decoder_decode(input_seq, hidden, context, kparams)
    jax.block_until_ready((pred_seq, h_final))

    # Reference: iterate the pure-JAX per-step mirror of the PyTorch forward.
    h_ref = hidden
    preds_ref = []
    for t in range(SEQ):
        p, h_ref = reference_forward(input_seq[t], h_ref, context, torch_params)
        preds_ref.append(p)
    pred_ref = jnp.stack(preds_ref, axis=0)

    assert pred_seq.shape == (SEQ, BATCH, OUTPUT_DIM)
    assert h_final.shape == (1, BATCH, HID_DIM)
    assert jnp.allclose(pred_seq, pred_ref, atol=2e-3, rtol=2e-3), "prediction mismatch"
    assert jnp.allclose(h_final, h_ref, atol=2e-3, rtol=2e-3), "hidden mismatch"

    # Single-step path (exact Decoder.forward(input, hidden, context) semantics).
    pred1, h1 = decoder_forward(input_seq[0], hidden, context, kparams)
    jax.block_until_ready((pred1, h1))
    p1_ref, h1_ref = reference_forward(input_seq[0], hidden, context, torch_params)
    assert pred1.shape == (BATCH, OUTPUT_DIM) and h1.shape == (1, BATCH, HID_DIM)
    assert jnp.allclose(pred1, p1_ref, atol=2e-3, rtol=2e-3), "single-step prediction mismatch"
    assert jnp.allclose(h1, h1_ref, atol=2e-3, rtol=2e-3), "single-step hidden mismatch"

    print("KERNEL_OK")
</pallas_src>

<mosaic_0001>
module attributes {stable_mosaic.version = 11 : i64} {
  func.func @_decoder_seq_kernel(%arg0: i32, %arg1: memref<8x8xi32, #tpu.memory_space<smem>>, %arg2: memref<128x32xf32, #tpu.memory_space<vmem>>, %arg3: memref<8x32xf32, #tpu.memory_space<vmem>>, %arg4: memref<8x32xf32, #tpu.memory_space<vmem>>, %arg5: memref<128x256xbf16, #tpu.memory_space<vmem>>, %arg6: memref<32x128xbf16, #tpu.memory_space<vmem>>, %arg7: memref<1x8x128xf32, #tpu.memory_space<vmem>>, %arg8: memref<8x32xf32, #tpu.memory_space<vmem>>, %arg9: memref<8x32xf32, #tpu.memory_space<vmem>>, %arg10: memref<8x128xbf16, #tpu.memory_space<vmem>>, %arg11: memref<8x32xf32, #tpu.memory_space<vmem>>) attributes {dimension_semantics = [#tpu.dimension_semantics<arbitrary>], iteration_bounds = array<i64: 8>, scalar_prefetch = 1 : i64, scratch_operands = 3 : i64, tpu.core_type = #tpu.core_type<tc>, window_params = [{pipeline_mode = #tpu.pipeline_mode<synchronous>, transform_indices = @transform_0, window_bounds = array<i64: 128, 32>}, {pipeline_mode = #tpu.pipeline_mode<synchronous>, transform_indices = @transform_1, window_bounds = array<i64: 8, 32>}, {pipeline_mode = #tpu.pipeline_mode<synchronous>, transform_indices = @transform_2, window_bounds = array<i64: 8, 32>}, {pipeline_mode = #tpu.pipeline_mode<synchronous>, transform_indices = @transform_3, window_bounds = array<i64: 128, 256>}, {pipeline_mode = #tpu.pipeline_mode<synchronous>, transform_indices = @transform_4, window_bounds = array<i64: 32, 128>}, {transform_indices = @transform_5, window_bounds = array<i64: 1, 8, 128>}, {pipeline_mode = #tpu.pipeline_mode<synchronous>, transform_indices = @transform_6, window_bounds = array<i64: 8, 32>}]} {
    %c0_i32 = arith.constant 0 : i32
    %0 = arith.cmpi eq, %arg0, %c0_i32 : i32
    %1 = arith.extui %0 : i1 to i32
    %c0_i32_0 = arith.constant 0 : i32
    %2 = arith.cmpi ne, %1, %c0_i32_0 : i32
    scf.if %2 {
      %84 = tpu.iota {dimensions = array<i32: 1>} : vector<8x128xi32>
      %c96_i32 = arith.constant 96 : i32
      %85 = vector.broadcast %c96_i32 : i32 to vector<8x128xi32>
      %86 = arith.cmpi eq, %84, %85 : vector<8x128xi32>
      %cst_49 = arith.constant 1.000000e+00 : f32
      %cst_50 = arith.constant 0.000000e+00 : f32
      %87 = vector.broadcast %cst_49 : f32 to vector<8x128xf32>
      %88 = vector.broadcast %cst_50 : f32 to vector<8x128xf32>
      %89 = arith.select %86, %87, %88 : vector<8x128xi1>, vector<8x128xf32>
      %90 = arith.truncf %89 : vector<8x128xf32> to vector<8x128xbf16>
      %c0_51 = arith.constant 0 : index
      %c0_52 = arith.constant 0 : index
      %91 = vector.load %arg10[%c0_51, %c0_52] : memref<8x128xbf16, #tpu.memory_space<vmem>>, vector<8x128xbf16>
      tpu.vector_store %arg10[%c0_51, %c0_52], %90 {strides = array<i32>} : memref<8x128xbf16, #tpu.memory_space<vmem>>, vector<8x128xbf16>,
      %c0_53 = arith.constant 0 : index
      %c0_54 = arith.constant 0 : index
      %92 = vector.load %arg4[%c0_53, %c0_54] : memref<8x32xf32, #tpu.memory_space<vmem>>, vector<8x32xf32>
      %93 = arith.truncf %92 : vector<8x32xf32> to vector<8x32xbf16>
      %c0_55 = arith.constant 0 : index
      %c32 = arith.constant 32 : index
      %94 = vector.load %arg10[%c0_55, %c32] : memref<8x128xbf16, #tpu.memory_space<vmem>>, vector<8x32xbf16>
      tpu.vector_store %arg10[%c0_55, %c32], %93 {strides = array<i32>} : memref<8x128xbf16, #tpu.memory_space<vmem>>, vector<8x32xbf16>,
      %c0_56 = arith.constant 0 : index
      %c0_57 = arith.constant 0 : index
      %95 = vector.load %arg3[%c0_56, %c0_57] : memref<8x32xf32, #tpu.memory_space<vmem>>, vector<8x32xf32>
      %c0_58 = arith.constant 0 : index
      %c0_59 = arith.constant 0 : index
      %96 = vector.load %arg11[%c0_58, %c0_59] : memref<8x32xf32, #tpu.memory_space<vmem>>, vector<8x32xf32>
      tpu.vector_store %arg11[%c0_58, %c0_59], %95 {strides = array<i32>} : memref<8x32xf32, #tpu.memory_space<vmem>>, vector<8x32xf32>,
    } else {
    }
    %3 = arith.index_cast %arg0 : i32 to index
    %c0 = arith.constant 0 : index
    %4 = memref.load %arg1[%3, %c0] : memref<8x8xi32, #tpu.memory_space<smem>>
    %5 = arith.index_cast %4 : i32 to index
    %c0_1 = arith.constant 0 : index
    %6 = vector.load %arg2[%5, %c0_1] : memref<128x32xf32, #tpu.memory_space<vmem>>, vector<1x32xf32>
    %c0_2 = arith.constant 0 : index
    %c0_3 = arith.constant 0 : index
    %7 = vector.load %arg9[%c0_2, %c0_3] : memref<8x32xf32, #tpu.memory_space<vmem>>, vector<1x32xf32>
    tpu.vector_store %arg9[%c0_2, %c0_3], %6 {strides = array<i32>} : memref<8x32xf32, #tpu.memory_space<vmem>>, vector<1x32xf32>,
    %8 = arith.index_cast %arg0 : i32 to index
    %c1 = arith.constant 1 : index
    %9 = memref.load %arg1[%8, %c1] : memref<8x8xi32, #tpu.memory_space<smem>>
    %10 = arith.index_cast %9 : i32 to index
    %c0_4 = arith.constant 0 : index
    %11 = vector.load %arg2[%10, %c0_4] : memref<128x32xf32, #tpu.memory_space<vmem>>, vector<1x32xf32>
    %c1_5 = arith.constant 1 : index
    %c0_6 = arith.constant 0 : index
    %12 = vector.load %arg9[%c1_5, %c0_6] : memref<8x32xf32, #tpu.memory_space<vmem>>, vector<1x32xf32>
    tpu.vector_store %arg9[%c1_5, %c0_6], %11 {strides = array<i32>} : memref<8x32xf32, #tpu.memory_space<vmem>>, vector<1x32xf32>,
    %13 = arith.index_cast %arg0 : i32 to index
    %c2 = arith.constant 2 : index
    %14 = memref.load %arg1[%13, %c2] : memref<8x8xi32, #tpu.memory_space<smem>>
    %15 = arith.index_cast %14 : i32 to index
    %c0_7 = arith.constant 0 : index
    %16 = vector.load %arg2[%15, %c0_7] : memref<128x32xf32, #tpu.memory_space<vmem>>, vector<1x32xf32>
    %c2_8 = arith.constant 2 : index
    %c0_9 = arith.constant 0 : index
    %17 = vector.load %arg9[%c2_8, %c0_9] : memref<8x32xf32, #tpu.memory_space<vmem>>, vector<1x32xf32>
    tpu.vector_store %arg9[%c2_8, %c0_9], %16 {strides = array<i32>} : memref<8x32xf32, #tpu.memory_space<vmem>>, vector<1x32xf32>,
    %18 = arith.index_cast %arg0 : i32 to index
    %c3 = arith.constant 3 : index
    %19 = memref.load %arg1[%18, %c3] : memref<8x8xi32, #tpu.memory_space<smem>>
    %20 = arith.index_cast %19 : i32 to index
    %c0_10 = arith.constant 0 : index
    %21 = vector.load %arg2[%20, %c0_10] : memref<128x32xf32, #tpu.memory_space<vmem>>, vector<1x32xf32>
    %c3_11 = arith.constant 3 : index
    %c0_12 = arith.constant 0 : index
    %22 = vector.load %arg9[%c3_11, %c0_12] : memref<8x32xf32, #tpu.memory_space<vmem>>, vector<1x32xf32>
    tpu.vector_store %arg9[%c3_11, %c0_12], %21 {strides = array<i32>} : memref<8x32xf32, #tpu.memory_space<vmem>>, vector<1x32xf32>,
    %23 = arith.index_cast %arg0 : i32 to index
    %c4 = arith.constant 4 : index
    %24 = memref.load %arg1[%23, %c4] : memref<8x8xi32, #tpu.memory_space<smem>>
    %25 = arith.index_cast %24 : i32 to index
    %c0_13 = arith.constant 0 : index
    %26 = vector.load %arg2[%25, %c0_13] : memref<128x32xf32, #tpu.memory_space<vmem>>, vector<1x32xf32>
    %c4_14 = arith.constant 4 : index
    %c0_15 = arith.constant 0 : index
    %27 = vector.load %arg9[%c4_14, %c0_15] : memref<8x32xf32, #tpu.memory_space<vmem>>, vector<1x32xf32>
    tpu.vector_store %arg9[%c4_14, %c0_15], %26 {strides = array<i32>} : memref<8x32xf32, #tpu.memory_space<vmem>>, vector<1x32xf32>,
    %28 = arith.index_cast %arg0 : i32 to index
    %c5 = arith.constant 5 : index
    %29 = memref.load %arg1[%28, %c5] : memref<8x8xi32, #tpu.memory_space<smem>>
    %30 = arith.index_cast %29 : i32 to index
    %c0_16 = arith.constant 0 : index
    %31 = vector.load %arg2[%30, %c0_16] : memref<128x32xf32, #tpu.memory_space<vmem>>, vector<1x32xf32>
    %c5_17 = arith.constant 5 : index
    %c0_18 = arith.constant 0 : index
    %32 = vector.load %arg9[%c5_17, %c0_18] : memref<8x32xf32, #tpu.memory_space<vmem>>, vector<1x32xf32>
    tpu.vector_store %arg9[%c5_17, %c0_18], %31 {strides = array<i32>} : memref<8x32xf32, #tpu.memory_space<vmem>>, vector<1x32xf32>,
    %33 = arith.index_cast %arg0 : i32 to index
    %c6 = arith.constant 6 : index
    %34 = memref.load %arg1[%33, %c6] : memref<8x8xi32, #tpu.memory_space<smem>>
    %35 = arith.index_cast %34 : i32 to index
    %c0_19 = arith.constant 0 : index
    %36 = vector.load %arg2[%35, %c0_19] : memref<128x32xf32, #tpu.memory_space<vmem>>, vector<1x32xf32>
    %c6_20 = arith.constant 6 : index
    %c0_21 = arith.constant 0 : index
    %37 = vector.load %arg9[%c6_20, %c0_21] : memref<8x32xf32, #tpu.memory_space<vmem>>, vector<1x32xf32>
    tpu.vector_store %arg9[%c6_20, %c0_21], %36 {strides = array<i32>} : memref<8x32xf32, #tpu.memory_space<vmem>>, vector<1x32xf32>,
    %38 = arith.index_cast %arg0 : i32 to index
    %c7 = arith.constant 7 : index
    %39 = memref.load %arg1[%38, %c7] : memref<8x8xi32, #tpu.memory_space<smem>>
    %40 = arith.index_cast %39 : i32 to index
    %c0_22 = arith.constant 0 : index
    %41 = vector.load %arg2[%40, %c0_22] : memref<128x32xf32, #tpu.memory_space<vmem>>, vector<1x32xf32>
    %c7_23 = arith.constant 7 : index
    %c0_24 = arith.constant 0 : index
    %42 = vector.load %arg9[%c7_23, %c0_24] : memref<8x32xf32, #tpu.memory_space<vmem>>, vector<1x32xf32>
    tpu.vector_store %arg9[%c7_23, %c0_24], %41 {strides = array<i32>} : memref<8x32xf32, #tpu.memory_space<vmem>>, vector<1x32xf32>,
    %c0_25 = arith.constant 0 : index
    %c0_26 = arith.constant 0 : index
    %43 = vector.load %arg9[%c0_25, %c0_26] : memref<8x32xf32, #tpu.memory_space<vmem>>, vector<8x32xf32>
    %44 = arith.truncf %43 : vector<8x32xf32> to vector<8x32xbf16>
    %c0_27 = arith.constant 0 : index
    %c0_28 = arith.constant 0 : index
    %45 = vector.load %arg10[%c0_27, %c0_28] : memref<8x128xbf16, #tpu.memory_space<vmem>>, vector<8x32xbf16>
    tpu.vector_store %arg10[%c0_27, %c0_28], %44 {strides = array<i32>} : memref<8x128xbf16, #tpu.memory_space<vmem>>, vector<8x32xbf16>,
    %c0_29 = arith.constant 0 : index
    %c0_30 = arith.constant 0 : index
    %46 = vector.load %arg11[%c0_29, %c0_30] : memref<8x32xf32, #tpu.memory_space<vmem>>, vector<8x32xf32>
    %47 = arith.truncf %46 : vector<8x32xf32> to vector<8x32xbf16>
    %c0_31 = arith.constant 0 : index
    %c64 = arith.constant 64 : index
    %48 = vector.load %arg10[%c0_31, %c64] : memref<8x128xbf16, #tpu.memory_space<vmem>>, vector<8x32xbf16>
    tpu.vector_store %arg10[%c0_31, %c64], %47 {strides = array<i32>} : memref<8x128xbf16, #tpu.memory_space<vmem>>, vector<8x32xbf16>,
    %c0_32 = arith.constant 0 : index
    %c0_33 = arith.constant 0 : index
    %49 = vector.load %arg10[%c0_32, %c0_33] : memref<8x128xbf16, #tpu.memory_space<vmem>>, vector<8x128xbf16>
    %c0_34 = arith.constant 0 : index
    %c0_35 = arith.constant 0 : index
    %50 = vector.load %arg5[%c0_34, %c0_35] : memref<128x256xbf16, #tpu.memory_space<vmem>>, vector<128x256xbf16>
    %cst = arith.constant dense<0.000000e+00> : vector<8x256xf32>
    %51 = tpu.matmul %49, %50, %cst {dimension_numbers = #tpu.dot_dimension_numbers<[1], [0], [0], [1], [0, 0, 1, 1], [], []>} : vector<8x128xbf16>, vector<128x256xbf16>, vector<8x256xf32> -> vector<8x256xf32>
    %52 = vector.extract_strided_slice %51 {offsets = [0, 0], sizes = [8, 32], strides = [1, 1]} : vector<8x256xf32> to vector<8x32xf32>
    %53 = arith.negf %52 : vector<8x32xf32>
    %54 = math.exp %53 : vector<8x32xf32>
    %cst_36 = arith.constant 1.000000e+00 : f32
    %55 = vector.broadcast %cst_36 : f32 to vector<8x32xf32>
    %56 = arith.addf %55, %54 : vector<8x32xf32>
    %57 = arith.divf %55, %56 : vector<8x32xf32>
    %58 = vector.extract_strided_slice %51 {offsets = [0, 32], sizes = [8, 32], strides = [1, 1]} : vector<8x256xf32> to vector<8x32xf32>
    %59 = arith.negf %58 : vector<8x32xf32>
    %60 = math.exp %59 : vector<8x32xf32>
    %cst_37 = arith.constant 1.000000e+00 : f32
    %61 = vector.broadcast %cst_37 : f32 to vector<8x32xf32>
    %62 = arith.addf %61, %60 : vector<8x32xf32>
    %63 = arith.divf %61, %62 : vector<8x32xf32>
    %64 = vector.extract_strided_slice %51 {offsets = [0, 64], sizes = [8, 32], strides = [1, 1]} : vector<8x256xf32> to vector<8x32xf32>
    %65 = vector.extract_strided_slice %51 {offsets = [0, 96], sizes = [8, 32], strides = [1, 1]} : vector<8x256xf32> to vector<8x32xf32>
    %66 = arith.mulf %57, %65 : vector<8x32xf32>
    %67 = arith.addf %64, %66 : vector<8x32xf32>
    %68 = math.tanh %67 : vector<8x32xf32>
    %cst_38 = arith.constant 1.000000e+00 : f32
    %69 = vector.broadcast %cst_38 : f32 to vector<8x32xf32>
    %70 = arith.subf %69, %63 : vector<8x32xf32>
    %71 = arith.mulf %70, %68 : vector<8x32xf32>
    %72 = arith.mulf %63, %46 : vector<8x32xf32>
    %73 = arith.addf %71, %72 : vector<8x32xf32>
    %74 = vector.extract_strided_slice %51 {offsets = [0, 128], sizes = [8, 128], strides = [1, 1]} : vector<8x256xf32> to vector<8x128xf32>
    %75 = arith.truncf %73 : vector<8x32xf32> to vector<8x32xbf16>
    %c0_39 = arith.constant 0 : index
    %c0_40 = arith.constant 0 : index
    %76 = vector.load %arg6[%c0_39, %c0_40] : memref<32x128xbf16, #tpu.memory_space<vmem>>, vector<32x128xbf16>
    %cst_41 = arith.constant dense<0.000000e+00> : vector<8x128xf32>
    %77 = tpu.matmul %75, %76, %cst_41 {dimension_numbers = #tpu.dot_dimension_numbers<[1], [0], [0], [1], [0, 0, 1, 1], [], []>} : vector<8x32xbf16>, vector<32x128xbf16>, vector<8x128xf32> -> vector<8x128xf32>
    %78 = arith.addf %74, %77 : vector<8x128xf32>
    %c0_42 = arith.constant 0 : index
    %c0_43 = arith.constant 0 : index
    %c0_44 = arith.constant 0 : index
    %79 = vector.load %arg7[%c0_42, %c0_43, %c0_44] : memref<1x8x128xf32, #tpu.memory_space<vmem>>, vector<1x8x128xf32>
    %80 = vector.shape_cast %79 : vector<1x8x128xf32> to vector<8x128xf32>
    %81 = vector.shape_cast %78 : vector<8x128xf32> to vector<1x8x128xf32>
    tpu.vector_store %arg7[%c0_42, %c0_43, %c0_44], %81 {strides = array<i32>} : memref<1x8x128xf32, #tpu.memory_space<vmem>>, vector<1x8x128xf32>,
    %c0_45 = arith.constant 0 : index
    %c0_46 = arith.constant 0 : index
    %82 = vector.load %arg11[%c0_45, %c0_46] : memref<8x32xf32, #tpu.memory_space<vmem>>, vector<8x32xf32>
    tpu.vector_store %arg11[%c0_45, %c0_46], %73 {strides = array<i32>} : memref<8x32xf32, #tpu.memory_space<vmem>>, vector<8x32xf32>,
    %c0_47 = arith.constant 0 : index
    %c0_48 = arith.constant 0 : index
    %83 = vector.load %arg8[%c0_47, %c0_48] : memref<8x32xf32, #tpu.memory_space<vmem>>, vector<8x32xf32>
    tpu.vector_store %arg8[%c0_47, %c0_48], %73 {strides = array<i32>} : memref<8x32xf32, #tpu.memory_space<vmem>>, vector<8x32xf32>,
    return
  }
  func.func @transform_0(%arg0: i32, %arg1: memref<8x8xi32, #tpu.memory_space<smem>>) -> (i32, i32) {
    %c0_i32 = arith.constant 0 : i32
    %c0_i32_0 = arith.constant 0 : i32
    %c0_i32_1 = arith.constant 0 : i32
    return %c0_i32, %c0_i32_0 : i32, i32
  }
  func.func @transform_1(%arg0: i32, %arg1: memref<8x8xi32, #tpu.memory_space<smem>>) -> (i32, i32) {
    %c0_i32 = arith.constant 0 : i32
    %c0_i32_0 = arith.constant 0 : i32
    %c0_i32_1 = arith.constant 0 : i32
    return %c0_i32, %c0_i32_0 : i32, i32
  }
  func.func @transform_2(%arg0: i32, %arg1: memref<8x8xi32, #tpu.memory_space<smem>>) -> (i32, i32) {
    %c0_i32 = arith.constant 0 : i32
    %c0_i32_0 = arith.constant 0 : i32
    %c0_i32_1 = arith.constant 0 : i32
    return %c0_i32, %c0_i32_0 : i32, i32
  }
  func.func @transform_3(%arg0: i32, %arg1: memref<8x8xi32, #tpu.memory_space<smem>>) -> (i32, i32) {
    %c0_i32 = arith.constant 0 : i32
    %c0_i32_0 = arith.constant 0 : i32
    %c0_i32_1 = arith.constant 0 : i32
    return %c0_i32, %c0_i32_0 : i32, i32
  }
  func.func @transform_4(%arg0: i32, %arg1: memref<8x8xi32, #tpu.memory_space<smem>>) -> (i32, i32) {
    %c0_i32 = arith.constant 0 : i32
    %c0_i32_0 = arith.constant 0 : i32
    %c0_i32_1 = arith.constant 0 : i32
    return %c0_i32, %c0_i32_0 : i32, i32
  }
  func.func @transform_5(%arg0: i32, %arg1: memref<8x8xi32, #tpu.memory_space<smem>>) -> (i32, i32, i32) {
    %c0_i32 = arith.constant 0 : i32
    %c0_i32_0 = arith.constant 0 : i32
    %c0_i32_1 = arith.constant 0 : i32
    return %arg0, %c0_i32, %c0_i32_0 : i32, i32, i32
  }
  func.func @transform_6(%arg0: i32, %arg1: memref<8x8xi32, #tpu.memory_space<smem>>) -> (i32, i32) {
    %c0_i32 = arith.constant 0 : i32
    %c0_i32_0 = arith.constant 0 : i32
    %c0_i32_1 = arith.constant 0 : i32
    return %c0_i32, %c0_i32_0 : i32, i32
  }
}

</mosaic_0001>

<bundles_post_ra>
// kernel: tpu_custom_call.1
= control target key start
LH: loop header
LB: loop body
LE: loop exit
PB: predicated region body
PF: predicated region fallthrough
CT: control target
= control target key end

     0   :  { %s1188_s0 = inlined_call_operand.vmem [shape: s32[8,8], index: 0, kind: input, shape index: {}]   ;;  %s1189_s1 = inlined_call_operand.vmem [shape: f32[128,32], index: 1, kind: input, shape index: {}]   ;;  %s1190_s2 = inlined_call_operand.vmem [shape: f32[8,32], index: 2, kind: input, shape index: {}]   ;;  %s1191_s3 = inlined_call_operand.vmem [shape: f32[8,32], index: 3, kind: input, shape index: {}]   ;;  %s1192_s4 = inlined_call_operand.vmem [shape: bf16[128,256], index: 4, kind: input, shape index: {}]   ;;  %s1193_s5 = inlined_call_operand.vmem [shape: bf16[32,128], index: 5, kind: input, shape index: {}]   ;;  %s1194_s6 = inlined_call_operand.hbm [shape: f32[8,8,128], index: 6, kind: output, shape index: {0}]   ;;  %s1195_s7 = inlined_call_operand.hbm [shape: f32[8,32], index: 7, kind: output, shape index: {1}]  }
   0x1   :  { %1201 = sst [smem:[#allocation17_spill]] %s1190_s2  ;;  %s13_s26 = sshll.u32 %s1188_s0, 4  ;;  %s14_s26 = int_to_ptr.vmem [resolvable:$true] %s13_s26 }
   0x2   :  { %1202 = sst [smem:[#allocation18_spill]] %s1191_s3  ;;  %s779_s27 = scalar_lea.vmem %s14_s26, 128 }
   0x3   :  { %p780_p0 = scmp.ne.s32.totalorder %s14_s26, %s779_s27  ;;  %p784_p1 = scmp.lt.s32.totalorder %s14_s26, %s14_s26 }
   0x4   :  { %p785_p2 = scmp.lt.s32.totalorder %s779_s27, %s779_s27 }
   0x6   :  { %p786_p3 = por %p785_p2, %p784_p1 }
   0x8   :  { %p787_p4 = pnand %p786_p3, %p780_p0 }
   0xa   :  { %790 = shalt.err (!%p787_p4)  }
   0xb   :  { %s887_s28 = smov [#allocation6]  }
   0xc   :  { %16 = dma.vmem_to_smem %s14_s26, 128, %s887_s28, [#allocation5] }
   0xd   :  { %861 = dma.done.wait [#allocation5], 128 }
   0xe   :  { %862 = vsyncadd [#allocation5], 4294967168 }
   0xf   :  { %18 = sfence }
  0x10   :  { %19 = vsyncpa [#allocation8], 0 }
  0x11   :  { %21 = vsyncpa [#allocation8 + $0x1], 0 }
  0x12   :  { %22 = vsyncpa [#allocation10], 0  ;;  %s941_s29 = smov 0   ;;  %s943_s30 = smov 0  }
  0x13   :  { %s945_s0 = smov 0   ;;  %s947_s8 = smov 0  }
  0x14 LB: > { %1203 = sst [smem:[#allocation14_spill]] %s881_s0  ;;  %s962_s9 = sadd.s32 4294967295, %s885_s8   ;;  %s885_s8 = sphi %s947_s8, %s1214_s8   ;;  %s881_s0 = sphi %s945_s0, %s1216_s0   ;;  %s877_s30 = sphi %s943_s30, %s1218_s30   ;;  %s873_s29 = sphi %s941_s29, %s1217_s29  }
  0x15   : > { %s645_s10 = sadd.s32 4294967294, %s885_s8   ;;  %s966_s11 = sadd.s32 1, %s885_s8  }
  0x16   : > { %1204 = sst [smem:[#allocation15_spill]] %s966_s11  ;;  %s140_s12 = sadd.s32 1, %s881_s0 }
  0x17   : > { %s137_s13 = ssub.s32 %s885_s8, %s966_s11  ;;  %p150_p5 = scmp.ne.s32.totalorder %s881_s0, %s877_s30 }
  0x18   : > { %p138_p6 = scmp.eq.s32.totalorder %s137_s13, 0  ;;  %p151_p7 = scmp.eq.s32.totalorder %s962_s9, 7 }
  0x19   : > { %p156_p8 = scmp.ne.s32.totalorder %s877_s30, %s873_s29  ;;  %p157_p9 = scmp.eq.s32.totalorder %s645_s10, 7 }
  0x1a   : > { %s977_s14 = scalar_select %p138_p6, %s881_s0, %s140_s12  }
  0x1b   : > { %p981_p10 = por %p151_p7, %p150_p5  ;;  %p985_p11 = por %p157_p9, %p156_p8 }
  0x1c   : > { %1205 = sst [smem:[#allocation16_spill]] %s977_s14  ;;  %p647_p12 = scmp.ge.s32.totalorder %s885_s8, 1 }
  0x1d   : > { %p211_p13 = scmp.lt.s32.totalorder %s885_s8, 9 }
  0x1f   : > { %p212_p0 = pnand %p647_p12, %p211_p13 }
  0x20   : > { %s1196_s17 = sand.u32 (!%p212_p0), 1, %s877_s30   ;;  %p649_p1 = scmp.ne.s32.totalorder (!%p212_p0), %s962_s9, 0 }
  0x21   : > { %215 = sbr.rel (%p212_p0) target bundleno = 1214 (0x4be), region = 40  ;;  %s994_s18 = sshll.u32 (!%p212_p0), %s1196_s17, 3 }
  0x28   : > { %240 = sbr.rel (%p649_p1) target bundleno = 165 (0xa5), region = 44  ;;  %s1208_s3 = sld [smem:[#allocation18_spill]] (!%p649_p1)  ;;  %v241_v1 = vlaneseq (!%p649_p1)  ;;  %vm258_vm0 = vcmask (!%p649_p1), 261120   ;;  %v889_v5 = vmov (!%p649_p1), 0.0   ;;  %vm255_vm2 = vcmask (!%p649_p1), 519424  }
  0x29   : > { %s1209_s2 = sld [smem:[#allocation17_spill]] (!%p649_p1)  ;;  %s888_s24 = smov (!%p649_p1), 32  }
  0x2a   : > { %v242_v4 = vand.u32 (!%p649_p1), 127, %v241_v1 }
  0x2c   : > { %vm243_vm1 = vcmp.eq.s32.totalorder (!%p649_p1), %v242_v4, 96 }
  0x2d   : > { %v244_v6 = vsel (!%p649_p1), %vm243_vm1, 1.0, %v889_v5 }
  0x2e   : > { %v247_v0 = vld [vmem:[%s1208_s3] sm:$0xff] (!%p649_p1)  ;;  %v245_v7 = vpack.c.bf16 (!%p649_p1), %v244_v6, %v244_v6 }
  0x2f   : > { %v257_v2 = vld [vmem:[%s1209_s2] sm:$0xff]  ;;  %v679_v3 = vpack.c.bf16 %v247_v0, %v247_v0 }
  0x30   : > { %259 = vst.msk [vmem:[#allocation4] sm:$0xff] %vm258_vm0, %v257_v2  ;;  %246 = vst [vmem:[#allocation3] sm:$0xf] %v245_v7 }
  0x31   : > { %252 = vrot.lane.b32.xlu0 %v679_v3, %s888_s24 }
  0xa3   : > { %v253_v8 = vpop.permute.xlu0 %252 }
  0xa4   : > { %256 = vst.msk [vmem:[#allocation3] sm:$0xf] %vm255_vm2, %v253_v8 }
  0xa5 PF: > { %v1004_v9 = vld [vmem:[#allocation4] sm:$0xff]  ;;  %s1007_s25 = sshll.u32 %s962_s9, 7  ;;  %v749_v12 = vld [vmem:[%s1192_s4] ss:$8 sps:$4 sm:$0xff]   ;;  %v750_v13 = vld [vmem:[%s1192_s4 + $0x14] ss:$8 sps:$4 sm:$0xff]  }
  0xa6   : > { %v680_v10 = vpack.c.bf16 %v1004_v9, %v1004_v9  ;;  %v747_v11 = vld [vmem:[%s1192_s4 + $0x4] ss:$8 sps:$4 sm:$0xff]   ;;  %s261_s12 = sld [smem:[#allocation6 + %s1007_s25]]  ;;  %s1197_s21 = smov 64   ;;  %v752_v14 = vld [vmem:[%s1192_s4 + $0x10] ss:$8 sps:$4 sm:$0xff]  }
  0xa7   : > { %412 = vmatprep.subr.bf16.mxu0 %v747_v11  ;;  %s266_s22 = sadd.s32 1, %s1007_s25  ;;  %s271_s23 = sadd.s32 2, %s1007_s25  ;;  %v753_v15 = vld [vmem:[%s1192_s4 + $0x24] ss:$8 sps:$4 sm:$0xff]   ;;  %vm264_vm3 = vcmask 253952   ;;  %v891_v21 = vmov 0  }
  0xa8   : > { %310 = vrot.lane.b32.xlu0 %v680_v10, %s1197_s21  ;;  %413 = vmatpush1.bf16.msra.mxu0 %v749_v12  ;;  %s267_s27 = sld [smem:[#allocation6 + %s266_s22]]  ;;  %s276_s13 = sadd.s32 3, %s1007_s25  ;;  %v755_v16 = vld [vmem:[%s1192_s4 + $0x20] ss:$8 sps:$4 sm:$0xff]   ;;  %v756_v18 = vld [vmem:[%s1192_s4 + $0x34] ss:$8 sps:$4 sm:$0xff]  }
  0xa9   : > { %s272_s28 = sld [smem:[#allocation6 + %s271_s23]]  ;;  %414 = vmatprep.subr.bf16.mxu0 %v750_v13  ;;  %s281_s3 = sadd.s32 4, %s1007_s25  ;;  %444 = vmatprep.mubr.bf16.mxu0 %v891_v21  ;;  %v758_v22 = vld [vmem:[%s1192_s4 + $0x30] ss:$8 sps:$4 sm:$0xff]   ;;  %v759_v23 = vld [vmem:[%s1192_s4 + $0x44] ss:$8 sps:$4 sm:$0xff]  }
  0xaa   : > { %s1031_s20 = sld [smem:[#allocation6 + %s276_s13]]  ;;  %s286_s17 = sadd.s32 5, %s1007_s25  ;;  %v761_v26 = vld [vmem:[%s1192_s4 + $0x40] ss:$8 sps:$4 sm:$0xff]   ;;  %v762_v28 = vld [vmem:[%s1192_s4 + $0x54] ss:$8 sps:$4 sm:$0xff]  }
  0xab   : > { %s282_s23 = sld [smem:[#allocation6 + %s281_s3]]  ;;  %s296_s22 = sadd.s32 7, %s1007_s25  ;;  %v764_v31 = vld [vmem:[%s1192_s4 + $0x50] ss:$8 sps:$4 sm:$0xff]   ;;  %v765_v32 = vld [vmem:[%s1192_s4 + $0x64] ss:$8 sps:$4 sm:$0xff]  }
  0xac   : > { %s262_s2 = scalar_lea.vmem %s1189_s1, %s261_s12  ;;  %415 = vmatpush1.bf16.msra.mxu0 %v752_v14  ;;  %s287_s19 = sld [smem:[#allocation6 + %s286_s17]]  ;;  %v767_v33 = vld [vmem:[%s1192_s4 + $0x60] ss:$8 sps:$4 sm:$0xff]   ;;  %v768_v34 = vld [vmem:[%s1192_s4 + $0x74] ss:$8 sps:$4 sm:$0xff]   ;;  %vm303_vm4 = vcmask 257024  }
  0xad   : > { %v263_v17 = vld [vmem:[%s262_s2] sm:$0x1]  ;;  %416 = vmatprep.subr.bf16.mxu0 %v753_v15  ;;  %s291_s12 = sadd.s32 6, %s1007_s25  ;;  %v770_v37 = vld [vmem:[%s1192_s4 + $0x70] ss:$8 sps:$4 sm:$0xff]   ;;  %vm313_vm5 = vcmask 781824  }
  0xae   : > { %265 = vst.msk [vmem:[#allocation2] sm:$0x1] %vm264_vm3, %v263_v17  ;;  %s268_s14 = scalar_lea.vmem %s1189_s1, %s267_s27  ;;  %s292_s3 = sld [smem:[#allocation6 + %s291_s12]]  ;;  %v771_v52 = vld [vmem:[%s1193_s5] sm:$0xff]   ;;  %v893_v53 = vmov 0.0   ;;  %v772_v54 = vld [vmem:[%s1193_s5 + $0x8] sm:$0xff]  }
  0xaf   : > { %s273_s2 = scalar_lea.vmem %s1189_s1, %s272_s28  ;;  %v269_v19 = vld [vmem:[%s268_s14] sm:$0x1]  ;;  %s297_s28 = sld [smem:[#allocation6 + %s296_s22]]  ;;  %684 = vmatprep.subr.bf16.mxu1 %v893_v53  ;;  %vm895_vm6 = vmmov 0   ;;  %vm502_vm7 = vcmask 261120  }
  0xb0   : > { %v274_v20 = vld [vmem:[%s273_s2] sm:$0x1]  ;;  %417 = vmatpush1.bf16.msra.mxu0 %v755_v16  ;;  %270 = vst.msk [vmem:[#allocation2 + $0x1] sm:$0x1] %vm264_vm3, %v269_v19  ;;  %s278_s27 = scalar_lea.vmem %s1189_s1, %s1031_s20  ;;  %s892_s20 = smov 32   ;;  %685 = vmatpush3.bf16.msra.mxu1 %v771_v52 }
  0xb1   : > { %275 = vst.msk [vmem:[#allocation2 + $0x2] sm:$0x1] %vm264_vm3, %v274_v20  ;;  %418 = vmatprep.subr.bf16.mxu0 %v756_v18  ;;  %v279_v24 = vld [vmem:[%s278_s27] sm:$0x1]  ;;  %s283_s13 = scalar_lea.vmem %s1189_s1, %s282_s23  ;;  %s1210_s22 = smov 64   ;;  %686 = vmatprep.subr.bf16.mxu1 %v893_v53 }
  0xb2   : > { %280 = vst.msk [vmem:[#allocation2 + $0x3] sm:$0x1] %vm264_vm3, %v279_v24  ;;  %v284_v25 = vld [vmem:[%s283_s13] sm:$0x1]  ;;  %s288_s2 = scalar_lea.vmem %s1189_s1, %s287_s19  ;;  %s894_s14 = smov 96   ;;  %688 = vmatprep.mubr.msk.bf16.mxu1 %vm895_vm6, %v893_v53 }
  0xb3   : > { %285 = vst.msk [vmem:[#allocation2 + $0x4] sm:$0x1] %vm264_vm3, %v284_v25  ;;  %v289_v27 = vld [vmem:[%s288_s2] sm:$0x1] }
  0xb4   : > { %419 = vmatpush1.bf16.msra.mxu0 %v758_v22  ;;  %290 = vst.msk [vmem:[#allocation2 + $0x5] sm:$0x1] %vm264_vm3, %v289_v27  ;;  %s293_s0 = scalar_lea.vmem %s1189_s1, %s292_s3  ;;  %687 = vmatpush3.bf16.msra.mxu1 %v772_v54 }
  0xb5   : > { %420 = vmatprep.subr.bf16.mxu0 %v759_v23  ;;  %v294_v29 = vld [vmem:[%s293_s0] sm:$0x1]  ;;  %s298_s27 = scalar_lea.vmem %s1189_s1, %s297_s28 }
  0xb6   : > { %295 = vst.msk [vmem:[#allocation2 + $0x6] sm:$0x1] %vm264_vm3, %v294_v29  ;;  %v299_v30 = vld [vmem:[%s298_s27] sm:$0x1]  ;;  %s896_s27 = smov [#allocation9]  }
  0xb7   : > { %300 = vst.msk [vmem:[#allocation2 + $0x7] sm:$0x1] %vm264_vm3, %v299_v30  ;;  %s579_s12 = sshll.u32 %s896_s27, 4  ;;  %s580_s12 = int_to_ptr.vmem [resolvable:$true] %s579_s12 }
  0xb8   : > { %421 = vmatpush1.bf16.msra.mxu0 %v761_v26  ;;  %s791_s21 = scalar_lea.vmem %s580_s12, 128  ;;  %p798_p5 = scmp.lt.s32.totalorder %s580_s12, %s580_s12 }
  0xb9   : > { %422 = vmatprep.subr.bf16.mxu0 %v762_v28  ;;  %p792_p2 = scmp.ne.s32.totalorder %s580_s12, %s791_s21  ;;  %p799_p6 = scmp.lt.s32.totalorder %s791_s21, %s791_s21 }
  0xbb   : > { %p793_p3 = pnand %p792_p2, %p151_p7  ;;  %p800_p8 = por %p799_p6, %p798_p5 }
  0xbc   : > { %423 = vmatpush1.bf16.msra.mxu0 %v764_v31 }
  0xbd   : > { %424 = vmatprep.subr.bf16.mxu0 %v765_v32  ;;  %p794_p4 = pneg %p793_p3 }
  0xbe   : > { %v301_v35 = vld [vmem:[#allocation2] sm:$0xff] }
  0xbf   : > { %v302_v36 = vpack.c.bf16 %v301_v35, %v301_v35  ;;  %p801_p9 = pnand %p800_p8, %p794_p4 }
  0xc0   : > { %425 = vmatpush1.bf16.msra.mxu0 %v767_v33 }
  0xc1   : > { %426 = vmatprep.subr.bf16.mxu0 %v768_v34  ;;  %304 = vst.msk [vmem:[#allocation3] sm:$0xf] %vm303_vm4, %v302_v36 }
  0xc4   : > { %427 = vmatpush1.bf16.msra.mxu0 %v770_v37 }
 0x11a   : > { %v311_v38 = vpop.permute.xlu0 %310 }
 0x11b   : > { %314 = vst.msk [vmem:[#allocation3] sm:$0xf] %vm313_vm5, %v311_v38 }
 0x122   : > { %v315_v39 = vld [vmem:[#allocation3] sm:$0xf] }
 0x123   : > { %445 = vmatmul.mubr.bf16.vlgmr.msra.gmra.mrb[0].mxu0 %v315_v39 }
 0x1f6   : > { %v446_v40 = vpop.f32.mrb[0].mxu0 }
 0x1f7   : > { %460 = vrot.lane.b32.xlu0 %v446_v40, %s892_s20  ;;  %v1103_v41 = vpop.f32.mrb[1].mxu0  ;;  %v669_v44 = vmul.f32 -1.442695, %v446_v40 }
 0x1f8   : > { %v450_v42 = vpop.f32.mrb[2].mxu0 }
 0x1f9   : > { %v451_v43 = vpop.f32.mrb[3].mxu0  ;;  %773 = vpow2.f32 %v669_v44 }
 0x1fb   : > { %477 = vrot.lane.b32.xlu0 %v1004_v9, %s892_s20 }
 0x203   : > { %v774_v45 = vpop.eup %773 }
 0x204   : > { %v456_v46 = vadd.f32 1.0, %v774_v45 }
 0x206   : > { %775 = vrcp.f32 %v456_v46 }
 0x210   : > { %v776_v47 = vpop.eup %775 }
 0x211   : > { %v470_v57 = vsub.f32 1.0, %v776_v47 }
 0x269   : > { %v461_v48 = vpop.permute.xlu0 %460 }
 0x26a   : > { %v463_v49 = vmul.f32 %v776_v47, %v461_v48 }
 0x26c   : > { %465 = vrot.lane.b32.xlu1 %v463_v49, %s1210_s22 }
 0x26d   : > { %v478_v56 = vpop.permute.xlu0 %477 }
 0x26e   : > { %v480_v59 = vmul.f32 %v776_v47, %v478_v56 }
 0x2de   : > { %v466_v50 = vpop.permute.xlu1 %465 }
 0x2df   : > { %v468_v51 = vadd.f32 %v466_v50, %v446_v40 }
 0x2e1   : > { %777 = vtanh.f32 %v468_v51 }
 0x2eb   : > { %v778_v55 = vpop.eup %777 }
 0x2ec   : > { %472 = vrot.lane.b32.xlu1 %v778_v55, %s894_s14 }
 0x35e   : > { %v473_v58 = vpop.permute.xlu1 %472 }
 0x35f   : > { %v475_v60 = vmul.f32 %v473_v58, %v470_v57 }
 0x361   : > { %v481_v61 = vadd.f32 %v480_v59, %v475_v60 }
 0x363   : > { %549 = vrot.lane.b32.xlu0 %v481_v61, %s894_s14  ;;  %v482_v62 = vpack.c.bf16 %v481_v61, %v481_v61 }
 0x365   : > { %488 = vrot.lane.b32.xlu1 %v482_v62, %s894_s14 }
 0x3d5   : > { %v550_v63 = vpop.permute.xlu0 %549 }
 0x3d6   : > { %552 = vst.msk [vmem:[#allocation4] sm:$0xff] %vm502_vm7, %v550_v63  ;;  %553 = vst.msk [vmem:[#allocation9] sm:$0xff] %vm502_vm7, %v550_v63 }
 0x3d7   : > { %v489_v0 = vpop.permute.xlu1 %488 }
 0x3d8   : > { %689 = vmatmul.mubr.msk.bf16.vlgmr.msra.gmra.mrb[0].mxu1 %vm502_vm7, %v489_v0 }
 0x3d9   : > { %804 = shalt.err (!%p801_p9)
}
 0x3da   : > { %s805_s3 = scalar_lea.hbm %s1195_s7, 128 }
 0x3db   : > { %p806_p12 = scmp.ne.s32.totalorder %s1195_s7, %s805_s3  ;;  %p811_p1 = scmp.lt.u32.totalorder %s805_s3, %s1195_s7 }
 0x3dd   : > { %p807_p13 = pnand %p806_p12, %p151_p7 }
 0x3df   : > { %p808_p0 = pneg %p807_p13 }
 0x3e1   : > { %p813_p2 = pnand %p811_p1, %p808_p0 }
 0x3e3   : > { %816 = shalt.err (!%p813_p2)
}
 0x3e4   : > { %694 = dma.vmem_to_hbm [thread:$0]  (%p151_p7), %s580_s12, 128, %s1195_s7, [#allocation10]  }
 0x3e5   : > { %s1211_s22 = scalar_lea.vmem [#allocation7], %s994_s18  ;;  %s1138_s19 = scalar_lea.hbm %s1194_s6, %s1007_s25 }
 0x3e6   : > { %s568_s23 = sshll.u32 %s1211_s22, 4  ;;  %s1212_s14 = smov %s1211_s22  ;;  %s1140_s23 = int_to_ptr.vmem [resolvable:$true] %s568_s23 }
 0x3e7   : > { %s1213_s27 = sand.u32 1, %s877_s30   ;;  %s817_s21 = scalar_lea.vmem %s1140_s23, 128 }
 0x3e8   : > { %s555_s12 = scalar_lea.sflag [#allocation8], %s1213_s27  ;;  %p818_p3 = scmp.ne.s32.totalorder %s1140_s23, %s817_s21 }
 0x3e9   : > { %s897_s13 = smov [#allocation7]  }
 0x3ea   : > { %p819_p4 = pnand %p818_p3, %p981_p10  ;;  %s821_s11 = sshll.u32 %s897_s13, 4  ;;  %s822_s11 = int_to_ptr.vmem [resolvable:$false] %s821_s11 }
 0x3eb   : > { %s823_s25 = scalar_lea.vmem %s822_s11, 256  ;;  %p824_p6 = scmp.lt.s32.totalorder %s1140_s23, %s822_s11 }
 0x3ec   : > { %p820_p5 = pneg %p819_p4  ;;  %p825_p8 = scmp.lt.s32.totalorder %s823_s25, %s817_s21 }
 0x3ee   : > { %p826_p9 = por %p825_p8, %p824_p6 }
 0x3f0   : > { %p827_p12 = pnand %p826_p9, %p820_p5 }
 0x4ab   : > { %v540_v1 = vpop.f32.mrb[0].mxu1 }
 0x4ac   : > { %v546_v2 = vadd.f32 %v540_v1, %v1103_v41  ;;  %v690_v3 = vpop.f32.mrb[1].mxu1 }
 0x4ad   : > { %v543_v4 = vpop.f32.mrb[2].mxu1 }
 0x4ae   : > { %547 = vst [vmem:[%s1212_s14] sm:$0xff] %v546_v2  ;;  %v691_v5 = vpop.f32.mrb[3].mxu1 }
 0x4af   : > { %830 = shalt.err (!%p827_p12)
}
 0x4b0   : > { %s831_s18 = scalar_lea.hbm %s1138_s19, 128  ;;  %s835_s28 = scalar_lea.hbm %s1194_s6, 1024 }
 0x4b1   : > { %p832_p13 = scmp.ne.s32.totalorder %s1138_s19, %s831_s18  ;;  %p836_p2 = scmp.lt.u32.totalorder %s1138_s19, %s1194_s6 }
 0x4b2   : > { %p837_p3 = scmp.lt.u32.totalorder %s835_s28, %s831_s18  ;;  %p839_p5 = scmp.lt.u32.totalorder %s831_s18, %s1138_s19 }
 0x4b3   : > { %p833_p0 = pnand %p832_p13, %p981_p10 }
 0x4b4   : > { %p838_p4 = por %p837_p3, %p836_p2 }
 0x4b5   : > { %p834_p1 = pneg %p833_p0 }
 0x4b6   : > { %p840_p6 = por %p839_p5, %p838_p4 }
 0x4b8   : > { %p841_p8 = pnand %p840_p6, %p834_p1 }
 0x4ba   : > { %844 = shalt.err (!%p841_p8)
}
 0x4bb   : > { %692 = dma.vmem_to_hbm [thread:$0]  (%p981_p10), %s1140_s23, 128, %s1138_s19, %s555_s12  }
 0x4bc   : > { %864 = dma.done.wait (%p151_p7), [#allocation10], 128  }
 0x4bd   : > { %866 = vsyncadd (%p151_p7), [#allocation10], 4294967168 }
 0x4be PF: > { %p704_p9 = scmp.ge.s32.totalorder %s885_s8, 2  ;;  %s595_s10 = sand.u32 1, %s873_s29  }
 0x4bf   : > { %s596_s20 = scalar_lea.sflag [#allocation8], %s595_s10 }
 0x4c0   : > { %p699_p12 = pnand %p704_p9, %p985_p11 }
 0x4c2   : > { %868 = dma.done.wait (!%p699_p12), %s596_s20, 128  }
 0x4c3   : > { %870 = vsyncadd (!%p699_p12), %s596_s20, 4294967168  ;;  %s1214_s8 = sld [smem:[#allocation15_spill]]  ;;  %s1215_s15 = sld [smem:[#allocation14_spill]] }
 0x4c4   : > { %s1216_s0 = sld [smem:[#allocation16_spill]]  ;;  %s1217_s29 = smov %s877_s30 }
 0x4c9   : > { %p25_p10 = scmp.ge.s32.totalorder %s1214_s8, 10   ;;  %s1218_s30 = smov %s1215_s15 }
 0x4cb   :  { %27 = sbr.rel (!%p25_p10) target bundleno = 20 (0x14), region = 92 }
 0x4d2   :  { %601 = vsyncpa [#allocation8], 1 }
 0x4d3   :  { %603 = vsyncpa [#allocation8 + $0x1], 1 }
 0x4d4   :  { %604 = vsyncpa [#allocation10], 1 }

</bundles_post_ra>
